<compile_context>
chip_gen: v7x
topology: tpu7x:2x2x1
jax: 0.10.0
libtpu: 0.0.40
codegen_flags: <defaults>
</compile_context>

<pallas_src>
import math

import jax
import jax.numpy as jnp
from jax.experimental import pallas as pl
from jax.experimental.pallas import tpu as pltpu


def _round_up(x, m):
    return ((x + m - 1) // m) * m


# ---------------------------------------------------------------------------
# Generation detection / VMEM budgets
# ---------------------------------------------------------------------------
_GEN_INFO = None


def _gen_info():
    """Generation-aware tiling and VMEM budget parameters."""
    global _GEN_INFO
    if _GEN_INFO is not None:
        return _GEN_INFO
    try:
        kind = jax.devices()[0].device_kind.lower()
    except Exception:  # pragma: no cover - defensive only
        kind = ""

    mib = 1024 * 1024
    if "v2" in kind or "v3" in kind:
        # Old generations: tiny VMEM, stay conservative (not a review target).
        info = dict(name="old", cores=1, vmem_limit=None, vmem_budget=8 * mib,
                    tiles=(128, 128, 256), fused_candidates=((128, 2),))
    elif any(t in kind for t in ("v5 lite", "v5lite", "v5e", "v5litepod")):
        # v5e: 128 MiB physical VMEM, 16 MiB scoped default -> raise the limit.
        info = dict(name="v5e", cores=1, vmem_limit=96 * mib,
                    vmem_budget=80 * mib, tiles=(256, 256, 512),
                    fused_candidates=((256, 2), (128, 2)))
    elif "v7" in kind or "7x" in kind:
        # v7x: 64 MiB physical VMEM per TensorCore, 2 TCs per chip.
        info = dict(name="v7x", cores=2, vmem_limit=48 * mib,
                    vmem_budget=40 * mib, tiles=(256, 256, 512),
                    fused_candidates=((256, 2), (128, 2)))
    else:
        # v6e / trillium / unknown-modern default: 128 MiB physical VMEM.
        info = dict(name="v6e", cores=1, vmem_limit=96 * mib,
                    vmem_budget=80 * mib, tiles=(256, 512, 512),
                    fused_candidates=((512, 3), (512, 2), (256, 2), (128, 2)))
    _GEN_INFO = info
    return info


# ---------------------------------------------------------------------------
# Capability probe: pipeline_mode=pl.Buffered(1) for grid-invariant operands.
# Falls back (silently) to default double-buffering if unsupported.
# ---------------------------------------------------------------------------
_BUFFERED1_OK = None


def _probe_copy_kernel(x_ref, o_ref):
    o_ref[...] = x_ref[...]


def _single_buffering_supported():
    global _BUFFERED1_OK
    if _BUFFERED1_OK is not None:
        return _BUFFERED1_OK
    try:
        spec = pl.BlockSpec((8, 128), lambda i: (0, 0),
                            pipeline_mode=pl.Buffered(1))
        fn = pl.pallas_call(
            _probe_copy_kernel,
            out_shape=jax.ShapeDtypeStruct((8, 128), jnp.float32),
            grid=(1,),
            in_specs=[spec],
            out_specs=pl.BlockSpec((8, 128), lambda i: (0, 0)),
        )
        out = jax.block_until_ready(fn(jnp.ones((8, 128), jnp.float32)))
        _BUFFERED1_OK = bool(jnp.all(out == 1.0))
    except Exception:  # any construction / lowering failure -> disable
        _BUFFERED1_OK = False
    return _BUFFERED1_OK


# ---------------------------------------------------------------------------
# Fused kernel (single-TC generations): out = A @ (X @ W) [+ bias]
# `support` is computed once on grid step 0 into a resident bf16 VMEM scratch
# and reused by every adjacency row tile (row axis must be "arbitrary").
# f32 operands are cast to bf16 in-kernel (VPU) right before the MXU dot.
# ---------------------------------------------------------------------------
def _fused_gcn_bias_kernel(a_ref, x_ref, w_ref, bias_ref, o_ref, supp_ref):
    @pl.when(pl.program_id(0) == 0)
    def _():
        supp_ref[...] = jnp.dot(
            x_ref[...].astype(jnp.bfloat16), w_ref[...].astype(jnp.bfloat16),
            preferred_element_type=jnp.float32).astype(supp_ref.dtype)

    out = jnp.dot(a_ref[...].astype(jnp.bfloat16), supp_ref[...],
                  preferred_element_type=jnp.float32)
    o_ref[...] = (out + bias_ref[...]).astype(o_ref.dtype)


def _fused_gcn_nobias_kernel(a_ref, x_ref, w_ref, o_ref, supp_ref):
    @pl.when(pl.program_id(0) == 0)
    def _():
        supp_ref[...] = jnp.dot(
            x_ref[...].astype(jnp.bfloat16), w_ref[...].astype(jnp.bfloat16),
            preferred_element_type=jnp.float32).astype(supp_ref.dtype)

    out = jnp.dot(a_ref[...].astype(jnp.bfloat16), supp_ref[...],
                  preferred_element_type=jnp.float32)
    o_ref[...] = out.astype(o_ref.dtype)


def _fused_vmem_bytes(N, Fin, Fout, tm, a_buffers, resident_buffers,
                      a_itemsize=4, x_itemsize=4, w_itemsize=4):
    """Conservative VMEM footprint of the fused path (bytes)."""
    Nk = _round_up(N, 128)
    Fin_p = _round_up(Fin, 128)
    Fout_p = _round_up(Fout, 128)
    a_bytes = a_buffers * tm * Nk * a_itemsize
    x_bytes = resident_buffers * Nk * Fin_p * x_itemsize
    w_bytes = resident_buffers * Fin_p * Fout_p * w_itemsize
    b_bytes = resident_buffers * Fout_p * 4
    supp_bytes = Nk * Fout_p * 2          # bf16 resident support scratch
    out_bytes = 2 * tm * Fout_p * 4       # double-buffered f32 output tile
    return a_bytes + x_bytes + w_bytes + b_bytes + supp_bytes + out_bytes


def gcn_fused(adjacency, x, weight, bias=None, *, tm=256, a_buffers=2,
              vmem_limit=None, out_dtype=jnp.float32):
    """Single-kernel A @ (X @ W) + b. Assumes the footprint fits in VMEM."""
    N = adjacency.shape[0]
    Fin = x.shape[1]
    Fout = weight.shape[1]

    # Pad to TPU-friendly multiples (lane dim -> 128, sublane dim -> 8).
    Nk = _round_up(N, 128)            # contraction dim of A @ support
    Fin_p = _round_up(Fin, 128)
    Fout_p = _round_up(Fout, 128)
    tm = min(tm, _round_up(N, 8))     # output row tile
    Nm = _round_up(N, tm)
    n_row_tiles = Nm // tm
    if a_buffers != 2 and n_row_tiles < a_buffers:
        a_buffers = 2                  # no point (and avoid odd corner cases)

    a = adjacency
    if (Nm, Nk) != (N, N):
        a = jnp.pad(a, ((0, Nm - N), (0, Nk - N)))
    xp = x
    if (Nk, Fin_p) != (N, Fin):
        xp = jnp.pad(xp, ((0, Nk - N), (0, Fin_p - Fin)))
    wp = weight
    if (Fin_p, Fout_p) != (Fin, Fout):
        wp = jnp.pad(wp, ((0, Fin_p - Fin), (0, Fout_p - Fout)))

    buffered_ok = _single_buffering_supported()

    def resident_spec(shape):
        # Grid-invariant operand: single-buffer it (halves its VMEM footprint).
        if buffered_ok:
            return pl.BlockSpec(shape, lambda i: (0, 0),
                                pipeline_mode=pl.Buffered(1))
        return pl.BlockSpec(shape, lambda i: (0, 0))

    if buffered_ok and a_buffers != 2:
        a_spec = pl.BlockSpec((tm, Nk), lambda i: (i, 0),
                              pipeline_mode=pl.Buffered(a_buffers))
    else:
        a_spec = pl.BlockSpec((tm, Nk), lambda i: (i, 0))

    in_specs = [
        a_spec,                               # A row tile (streamed, f32)
        resident_spec((Nk, Fin_p)),           # X resident
        resident_spec((Fin_p, Fout_p)),       # W resident
    ]
    operands = [a, xp, wp]
    kernel = _fused_gcn_nobias_kernel
    if bias is not None:
        b2 = bias.reshape(1, -1).astype(jnp.float32)
        if Fout_p != Fout:
            b2 = jnp.pad(b2, ((0, 0), (0, Fout_p - Fout)))
        in_specs.append(resident_spec((1, Fout_p)))
        operands.append(b2)
        kernel = _fused_gcn_bias_kernel

    out = pl.pallas_call(
        kernel,
        out_shape=jax.ShapeDtypeStruct((Nm, Fout_p), out_dtype),
        grid_spec=pltpu.PrefetchScalarGridSpec(
            num_scalar_prefetch=0,
            grid=(n_row_tiles,),
            in_specs=in_specs,
            out_specs=pl.BlockSpec((tm, Fout_p), lambda i: (i, 0)),
            # Resident bf16 support: no HBM round-trip of the intermediate.
            scratch_shapes=[pltpu.VMEM((Nk, Fout_p), jnp.bfloat16)],
        ),
        compiler_params=pltpu.CompilerParams(
            # Sequential: the support scratch written at step 0 is reused by
            # all later row tiles, so this axis cannot be megacore-parallel.
            dimension_semantics=("arbitrary",),
            vmem_limit_bytes=vmem_limit),
    )(*operands)

    if (Nm, Fout_p) != (N, Fout):
        out = out[:N, :Fout]
    return out


# ---------------------------------------------------------------------------
# General tiled matmul (+ optional fused bias), f32 accumulation.
# Prefers full output width / full contraction (RHS fully resident) when the
# VMEM budget allows, so the big LHS is streamed from HBM exactly once, and
# single-buffers any grid-invariant operand.
# ---------------------------------------------------------------------------
def _make_mm_kernel(with_bias, compute_dtype):
    def cast(v):
        return v if compute_dtype is None else v.astype(compute_dtype)

    if with_bias:
        def kernel(a_ref, b_ref, bias_ref, o_ref, acc_ref):
            @pl.when(pl.program_id(2) == 0)
            def _():
                acc_ref[...] = jnp.zeros_like(acc_ref)

            acc_ref[...] += jnp.dot(cast(a_ref[...]), cast(b_ref[...]),
                                    preferred_element_type=jnp.float32)

            @pl.when(pl.program_id(2) == pl.num_programs(2) - 1)
            def _():
                o_ref[...] = (acc_ref[...] + bias_ref[...]).astype(o_ref.dtype)
        return kernel

    def kernel(a_ref, b_ref, o_ref, acc_ref):
        @pl.when(pl.program_id(2) == 0)
        def _():
            acc_ref[...] = jnp.zeros_like(acc_ref)

        acc_ref[...] += jnp.dot(cast(a_ref[...]), cast(b_ref[...]),
                                preferred_element_type=jnp.float32)

        @pl.when(pl.program_id(2) == pl.num_programs(2) - 1)
        def _():
            o_ref[...] = acc_ref[...].astype(o_ref.dtype)
    return kernel


def matmul_pallas(a, b, bias=None, *, out_dtype=jnp.float32,
                  compute_dtype=None, tm=None, tn=None, tk=None):
    """Tiled o = a @ b (+ bias). Arbitrary shapes handled via zero padding."""
    M, K = a.shape
    K2, N = b.shape
    assert K == K2, (a.shape, b.shape)

    info = _gen_info()
    buffered_ok = _single_buffering_supported()
    budget = info["vmem_budget"]
    a_sz = a.dtype.itemsize
    b_sz = b.dtype.itemsize
    out_sz = jnp.dtype(out_dtype).itemsize

    Mp8 = _round_up(M, 8)
    Kp128 = _round_up(K, 128)
    Np128 = _round_up(N, 128)
    dtm, dtn, dtk = info["tiles"]

    if tm is None or tn is None or tk is None:
        tm0 = min(dtm, Mp8)
        tn_def = min(dtn, Np128)
        tk_def = min(dtk, Kp128)
        # Full output width whenever reasonable: the big LHS is not
        # re-streamed per output-column tile, and the output stays lane-dense.
        tn_wide = Np128 if Np128 <= max(512, dtn) else tn_def

        def footprint(tm_, tn_, tk_):
            Mp = _round_up(M, tm_)
            Kp = _round_up(K, tk_)
            Np = _round_up(N, tn_)
            gi, gj, gk = Mp // tm_, Np // tn_, Kp // tk_
            abuf = 1 if (buffered_ok and gi == 1 and gk == 1) else 2
            bbuf = 1 if (buffered_ok and gk == 1 and gj == 1) else 2
            return (abuf * tm_ * tk_ * a_sz + bbuf * tk_ * tn_ * b_sz
                    + 2 * tm_ * tn_ * out_sz      # output tile
                    + tm_ * tn_ * 4               # f32 accumulator scratch
                    + 2 * tn_ * 4)                # bias tile

        candidates = [
            (tm0, Np128, Kp128),     # RHS fully resident, LHS read exactly once
            (tm0, tn_wide, Kp128),
            (tm0, tn_wide, tk_def),
            (tm0, tn_def, tk_def),
            (max(8, min(128, Mp8)), tn_def, tk_def),
        ]
        sel = candidates[-1]
        for c in candidates:
            if footprint(*c) <= budget:
                sel = c
                break
        tm = sel[0] if tm is None else tm
        tn = sel[1] if tn is None else tn
        tk = sel[2] if tk is None else tk
    tm = min(tm, Mp8)
    tn = min(tn, Np128)
    tk = min(tk, Kp128)

    Mp, Kp, Np = _round_up(M, tm), _round_up(K, tk), _round_up(N, tn)
    if (Mp, Kp) != (M, K):
        a = jnp.pad(a, ((0, Mp - M), (0, Kp - K)))
    if (Kp, Np) != (K, N):
        b = jnp.pad(b, ((0, Kp - K), (0, Np - N)))
    gi, gj, gk = Mp // tm, Np // tn, Kp // tk

    def spec(shape, index_map, invariant):
        if buffered_ok and invariant:
            return pl.BlockSpec(shape, index_map, pipeline_mode=pl.Buffered(1))
        return pl.BlockSpec(shape, index_map)

    in_specs = [
        spec((tm, tk), lambda i, j, k: (i, k), invariant=(gi == 1 and gk == 1)),
        spec((tk, tn), lambda i, j, k: (k, j), invariant=(gk == 1 and gj == 1)),
    ]
    operands = [a, b]
    kernel = _make_mm_kernel(bias is not None, compute_dtype)
    if bias is not None:
        bias2d = bias.reshape(1, -1).astype(jnp.float32)
        if Np != N:
            bias2d = jnp.pad(bias2d, ((0, 0), (0, Np - N)))
        in_specs.append(spec((1, tn), lambda i, j, k: (0, j),
                             invariant=(gj == 1)))
        operands.append(bias2d)

    out = pl.pallas_call(
        kernel,
        out_shape=jax.ShapeDtypeStruct((Mp, Np), out_dtype),
        grid_spec=pltpu.PrefetchScalarGridSpec(
            num_scalar_prefetch=0,
            grid=(gi, gj, gk),
            in_specs=in_specs,
            out_specs=pl.BlockSpec((tm, tn), lambda i, j, k: (i, j)),
            scratch_shapes=[pltpu.VMEM((tm, tn), jnp.float32)],
        ),
        compiler_params=pltpu.CompilerParams(
            # Row/col axes parallel -> shards across both TCs on v7x.
            dimension_semantics=("parallel", "parallel", "arbitrary"),
            vmem_limit_bytes=info["vmem_limit"]),
    )(*operands)

    if (Mp, Np) != (M, N):
        out = out[:M, :N]
    return out


# ---------------------------------------------------------------------------
# Module
# ---------------------------------------------------------------------------
class GraphConvolution:
    """JAX/Pallas port of the PyTorch GraphConvolution module."""

    def __init__(self, input_dim, output_dim, use_bias=True, *, key):
        self.input_dim = input_dim
        self.output_dim = output_dim
        self.use_bias = use_bias
        # kaiming_uniform_ (a=0, fan_in mode) on an (input_dim, output_dim)
        # tensor: PyTorch's fan_in for a 2-D tensor is size(1) == output_dim.
        # (Intentional fidelity to the reference, not "true" fan_in.)
        fan_in = output_dim
        bound = math.sqrt(2.0) * math.sqrt(3.0 / fan_in)
        self.weight = jax.random.uniform(
            key, (input_dim, output_dim), jnp.float32, -bound, bound)
        self.bias = (jnp.zeros((output_dim,), jnp.float32)
                     if use_bias else None)

    def __call__(self, adjacency, input_feature):
        # TODO(synk): torch.sparse.mm has no Pallas TPU equivalent; the
        # adjacency is treated as a dense (N, N) matrix.
        # No wrapper-level bf16 pre-cast: the single-use f32 adjacency/features
        # are loaded as f32 tiles and cast to bf16 inside the kernel.
        a = adjacency
        x = input_feature
        w = self.weight
        bias = self.bias if self.use_bias else None

        info = _gen_info()
        n = a.shape[0]
        fin = x.shape[1]
        fout = w.shape[1]

        if info["cores"] == 1:
            # Single-TC generations: fused single kernel, support never
            # leaves VMEM. Pick the largest row tile that fits the budget.
            buffered_ok = _single_buffering_supported()
            res_buf = 1 if buffered_ok else 2
            for cand_tm, cand_abuf in info["fused_candidates"]:
                eff_tm = min(cand_tm, _round_up(n, 8))
                abuf = cand_abuf if buffered_ok else 2
                need = _fused_vmem_bytes(
                    n, fin, fout, eff_tm, abuf, res_buf,
                    a.dtype.itemsize, x.dtype.itemsize, w.dtype.itemsize)
                if need <= info["vmem_budget"]:
                    return gcn_fused(a, x, w, bias, tm=eff_tm, a_buffers=abuf,
                                     vmem_limit=info["vmem_limit"])

        # v7x (2 TensorCores) or too big for the fused path: two calls.
        # The A @ support call has parallel row tiles (shards across both TCs
        # on v7x) and keeps support resident / read once when it fits; the
        # extra cost is only the tiny N x Fout bf16 support round-trip.
        support = matmul_pallas(x, w, None, out_dtype=jnp.bfloat16,
                                compute_dtype=jnp.bfloat16)
        return matmul_pallas(a, support, bias, out_dtype=jnp.float32,
                             compute_dtype=jnp.bfloat16)


if __name__ == "__main__":
    key = jax.random.PRNGKey(0)
    k_adj, k_x, k_w = jax.random.split(key, 3)

    num_nodes = 128     # N
    input_dim = 256     # F_in
    output_dim = 128    # F_out

    # Dense "normalized adjacency"-like matrix and node features.
    adjacency = jax.random.uniform(k_adj, (num_nodes, num_nodes),
                                   jnp.float32) / num_nodes
    input_feature = jax.random.normal(k_x, (num_nodes, input_dim),
                                      jnp.float32)

    gcn = GraphConvolution(input_dim, output_dim, use_bias=True, key=k_w)

    out = jax.block_until_ready(gcn(adjacency, input_feature))

    # Pure-JAX f32 reference (same semantics as the PyTorch forward).
    ref = adjacency @ (input_feature @ gcn.weight) + gcn.bias
    assert out.shape == (num_nodes, output_dim)
    # bf16 MXU compute with f32 accumulation -> loosened tolerance vs f32 ref.
    assert jnp.allclose(out, ref, rtol=2e-2, atol=2e-2), \
        float(jnp.max(jnp.abs(out - ref)))

    # Exercise the general tiled path with non-tile-divisible shapes
    # (padding + optional-bias handling), in native f32 compute.
    m, kk, nn = 200, 300, 72
    aa = jax.random.normal(jax.random.PRNGKey(1), (m, kk), jnp.float32)
    bb = jax.random.normal(jax.random.PRNGKey(2), (kk, nn), jnp.float32)
    cc = jax.random.normal(jax.random.PRNGKey(3), (nn,), jnp.float32)
    got = jax.block_until_ready(matmul_pallas(aa, bb, cc))
    assert jnp.allclose(got, aa @ bb + cc, rtol=1e-2, atol=1e-2)
    got_nb = jax.block_until_ready(matmul_pallas(aa, bb))
    assert jnp.allclose(got_nb, aa @ bb, rtol=1e-2, atol=1e-2)

    # Also exercise the un-fused (row-parallel, resident-support) path that
    # v7x takes, regardless of which generation we are running on.
    support = matmul_pallas(input_feature, gcn.weight, None,
                            out_dtype=jnp.bfloat16, compute_dtype=jnp.bfloat16)
    out2 = jax.block_until_ready(
        matmul_pallas(adjacency, support, gcn.bias,
                      out_dtype=jnp.float32, compute_dtype=jnp.bfloat16))
    assert jnp.allclose(out2, ref, rtol=2e-2, atol=2e-2)

    print("KERNEL_OK")
</pallas_src>

<mosaic_0001>
module attributes {stable_mosaic.version = 11 : i64} {
  func.func @_probe_copy_kernel(%arg0: i32, %arg1: memref<8x128xf32, #tpu.memory_space<vmem>>, %arg2: memref<8x128xf32, #tpu.memory_space<vmem>>) attributes {dimension_semantics = [#tpu.dimension_semantics<arbitrary>], iteration_bounds = array<i64: 1>, scalar_prefetch = 0 : i64, scratch_operands = 0 : i64, tpu.core_type = #tpu.core_type<tc>, window_params = [{pipeline_mode = #tpu.pipeline_mode<synchronous>, transform_indices = @transform_0, window_bounds = array<i64: 8, 128>}, {pipeline_mode = #tpu.pipeline_mode<synchronous>, transform_indices = @transform_1, window_bounds = array<i64: 8, 128>}]} {
    %c0 = arith.constant 0 : index
    %c0_0 = arith.constant 0 : index
    %0 = vector.load %arg1[%c0, %c0_0] : memref<8x128xf32, #tpu.memory_space<vmem>>, vector<8x128xf32>
    %c0_1 = arith.constant 0 : index
    %c0_2 = arith.constant 0 : index
    %1 = vector.load %arg2[%c0_1, %c0_2] : memref<8x128xf32, #tpu.memory_space<vmem>>, vector<8x128xf32>
    tpu.vector_store %arg2[%c0_1, %c0_2], %0 {strides = array<i32>} : memref<8x128xf32, #tpu.memory_space<vmem>>, vector<8x128xf32>,
    return
  }
  func.func @transform_0(%arg0: i32) -> (i32, i32) {
    %c0_i32 = arith.constant 0 : i32
    %c0_i32_0 = arith.constant 0 : i32
    %c0_i32_1 = arith.constant 0 : i32
    return %c0_i32, %c0_i32_0 : i32, i32
  }
  func.func @transform_1(%arg0: i32) -> (i32, i32) {
    %c0_i32 = arith.constant 0 : i32
    %c0_i32_0 = arith.constant 0 : i32
    %c0_i32_1 = arith.constant 0 : i32
    return %c0_i32, %c0_i32_0 : i32, i32
  }
}

module attributes {stable_mosaic.version = 11 : i64} {
  func.func @_fused_gcn_bias_kernel(%arg0: i32, %arg1: memref<128x128xf32, #tpu.memory_space<vmem>>, %arg2: memref<128x256xf32, #tpu.memory_space<vmem>>, %arg3: memref<256x128xf32, #tpu.memory_space<vmem>>, %arg4: memref<1x128xf32, #tpu.memory_space<vmem>>, %arg5: memref<128x128xf32, #tpu.memory_space<vmem>>, %arg6: memref<128x128xbf16, #tpu.memory_space<vmem>>) attributes {dimension_semantics = [#tpu.dimension_semantics<arbitrary>], iteration_bounds = array<i64: 1>, scalar_prefetch = 0 : i64, scratch_operands = 1 : i64, tpu.core_type = #tpu.core_type<tc>, window_params = [{transform_indices = @transform_0, window_bounds = array<i64: 128, 128>}, {pipeline_mode = #tpu.pipeline_mode<synchronous>, transform_indices = @transform_1, window_bounds = array<i64: 128, 256>}, {pipeline_mode = #tpu.pipeline_mode<synchronous>, transform_indices = @transform_2, window_bounds = array<i64: 256, 128>}, {pipeline_mode = #tpu.pipeline_mode<synchronous>, transform_indices = @transform_3, window_bounds = array<i64: 1, 128>}, {transform_indices = @transform_4, window_bounds = array<i64: 128, 128>}]} {
    %c0_i32 = arith.constant 0 : i32
    %0 = arith.cmpi eq, %arg0, %c0_i32 : i32
    %1 = arith.extui %0 : i1 to i32
    %c0_i32_0 = arith.constant 0 : i32
    %2 = arith.cmpi ne, %1, %c0_i32_0 : i32
    scf.if %2 {
      %c0_8 = arith.constant 0 : index
      %c0_9 = arith.constant 0 : index
      %11 = vector.load %arg2[%c0_8, %c0_9] : memref<128x256xf32, #tpu.memory_space<vmem>>, vector<128x256xf32>
      %12 = arith.truncf %11 : vector<128x256xf32> to vector<128x256xbf16>
      %c0_10 = arith.constant 0 : index
      %c0_11 = arith.constant 0 : index
      %13 = vector.load %arg3[%c0_10, %c0_11] : memref<256x128xf32, #tpu.memory_space<vmem>>, vector<256x128xf32>
      %14 = arith.truncf %13 : vector<256x128xf32> to vector<256x128xbf16>
      %cst_12 = arith.constant dense<0.000000e+00> : vector<128x128xf32>
      %15 = tpu.matmul %12, %14, %cst_12 {dimension_numbers = #tpu.dot_dimension_numbers<[1], [0], [0], [1], [0, 0, 1, 1], [], []>} : vector<128x256xbf16>, vector<256x128xbf16>, vector<128x128xf32> -> vector<128x128xf32>
      %16 = arith.truncf %15 : vector<128x128xf32> to vector<128x128xbf16>
      %c0_13 = arith.constant 0 : index
      %c0_14 = arith.constant 0 : index
      %17 = vector.load %arg6[%c0_13, %c0_14] : memref<128x128xbf16, #tpu.memory_space<vmem>>, vector<128x128xbf16>
      tpu.vector_store %arg6[%c0_13, %c0_14], %16 {strides = array<i32>} : memref<128x128xbf16, #tpu.memory_space<vmem>>, vector<128x128xbf16>,
    } else {
    }
    %c0 = arith.constant 0 : index
    %c0_1 = arith.constant 0 : index
    %3 = vector.load %arg1[%c0, %c0_1] : memref<128x128xf32, #tpu.memory_space<vmem>>, vector<128x128xf32>
    %4 = arith.truncf %3 : vector<128x128xf32> to vector<128x128xbf16>
    %c0_2 = arith.constant 0 : index
    %c0_3 = arith.constant 0 : index
    %5 = vector.load %arg6[%c0_2, %c0_3] : memref<128x128xbf16, #tpu.memory_space<vmem>>, vector<128x128xbf16>
    %cst = arith.constant dense<0.000000e+00> : vector<128x128xf32>
    %6 = tpu.matmul %4, %5, %cst {dimension_numbers = #tpu.dot_dimension_numbers<[1], [0], [0], [1], [0, 0, 1, 1], [], []>} : vector<128x128xbf16>, vector<128x128xbf16>, vector<128x128xf32> -> vector<128x128xf32>
    %c0_4 = arith.constant 0 : index
    %c0_5 = arith.constant 0 : index
    %7 = vector.load %arg4[%c0_4, %c0_5] : memref<1x128xf32, #tpu.memory_space<vmem>>, vector<1x128xf32>
    %8 = vector.broadcast %7 : vector<1x128xf32> to vector<128x128xf32>
    %9 = arith.addf %6, %8 : vector<128x128xf32>
    %c0_6 = arith.constant 0 : index
    %c0_7 = arith.constant 0 : index
    %10 = vector.load %arg5[%c0_6, %c0_7] : memref<128x128xf32, #tpu.memory_space<vmem>>, vector<128x128xf32>
    tpu.vector_store %arg5[%c0_6, %c0_7], %9 {strides = array<i32>} : memref<128x128xf32, #tpu.memory_space<vmem>>, vector<128x128xf32>,
    return
  }
  func.func @transform_0(%arg0: i32) -> (i32, i32) {
    %c0_i32 = arith.constant 0 : i32
    %c0_i32_0 = arith.constant 0 : i32
    return %arg0, %c0_i32 : i32, i32
  }
  func.func @transform_1(%arg0: i32) -> (i32, i32) {
    %c0_i32 = arith.constant 0 : i32
    %c0_i32_0 = arith.constant 0 : i32
    %c0_i32_1 = arith.constant 0 : i32
    return %c0_i32, %c0_i32_0 : i32, i32
  }
  func.func @transform_2(%arg0: i32) -> (i32, i32) {
    %c0_i32 = arith.constant 0 : i32
    %c0_i32_0 = arith.constant 0 : i32
    %c0_i32_1 = arith.constant 0 : i32
    return %c0_i32, %c0_i32_0 : i32, i32
  }
  func.func @transform_3(%arg0: i32) -> (i32, i32) {
    %c0_i32 = arith.constant 0 : i32
    %c0_i32_0 = arith.constant 0 : i32
    %c0_i32_1 = arith.constant 0 : i32
    return %c0_i32, %c0_i32_0 : i32, i32
  }
  func.func @transform_4(%arg0: i32) -> (i32, i32) {
    %c0_i32 = arith.constant 0 : i32
    %c0_i32_0 = arith.constant 0 : i32
    return %arg0, %c0_i32 : i32, i32
  }
}

</mosaic_0001>

<bundles_post_ra>
// kernel: tpu_custom_call.1
= control target key start
LH: loop header
LB: loop body
LE: loop exit
PB: predicated region body
PF: predicated region fallthrough
CT: control target
= control target key end

     0   :  { %6 = vsyncpa [#allocation3], 0  ;;  %s124_s0 = inlined_call_operand.hbm [shape: f32[8,128], index: 0, kind: input, shape index: {}]   ;;  %s125_s1 = inlined_call_operand.hbm [shape: f32[8,128], index: 1, kind: output, shape index: {}]  }
   0x1   :  { %7 = vsyncpa [#allocation4], 0  ;;  %s88_s6 = smov [#allocation2]   ;;  %s40_s10 = scalar_lea.hbm %s124_s0, 128 }
   0x2   :  { %s14_s7 = sshll.u32 %s88_s6, 4  ;;  %p41_p0 = scmp.ne.s32.totalorder %s124_s0, %s40_s10  ;;  %s15_s7 = int_to_ptr.vmem [resolvable:$true] %s14_s7 }
   0x3   :  { %p44_p1 = scmp.lt.u32.totalorder %s40_s10, %s124_s0 }
   0x5   :  { %p46_p2 = pnand %p44_p1, %p41_p0 }
   0x7   :  { %49 = shalt.err (!%p46_p2)
}
   0x8   :  { %s50_s15 = scalar_lea.vmem %s15_s7, 128  ;;  %p55_p4 = scmp.lt.s32.totalorder %s15_s7, %s15_s7 }
   0x9   :  { %p51_p3 = scmp.ne.s32.totalorder %s15_s7, %s50_s15  ;;  %p56_p5 = scmp.lt.s32.totalorder %s50_s15, %s50_s15 }
   0xb   :  { %p57_p6 = por %p56_p5, %p55_p4 }
   0xd   :  { %p58_p7 = pnand %p57_p6, %p51_p3 }
   0xf   :  { %61 = shalt.err (!%p58_p7)
}
  0x10   :  { %17 = dma.hbm_to_vmem [thread:$0]  %s124_s0, 128, %s15_s7, [#allocation3]  }
  0x11   :  { %84 = dma.done.wait [#allocation3], 128  }
  0x12   :  { %85 = vsyncadd [#allocation3], 4294967168  ;;  %s89_s18 = smov [#allocation5]   ;;  %v21_v0 = vld [vmem:[#allocation2] sm:$0xff] }
  0x13   :  { %s29_s19 = sshll.u32 %s89_s18, 4  ;;  %22 = vst [vmem:[#allocation5] sm:$0xff] %v21_v0  ;;  %s30_s19 = int_to_ptr.vmem [resolvable:$true] %s29_s19 }
  0x14   :  { %s62_s20 = scalar_lea.vmem %s30_s19, 128  ;;  %p67_p9 = scmp.lt.s32.totalorder %s30_s19, %s30_s19 }
  0x15   :  { %p63_p8 = scmp.ne.s32.totalorder %s30_s19, %s62_s20  ;;  %p68_p10 = scmp.lt.s32.totalorder %s62_s20, %s62_s20 }
  0x17   :  { %p69_p11 = por %p68_p10, %p67_p9 }
  0x19   :  { %p70_p12 = pnand %p69_p11, %p63_p8 }
  0x1b   :  { %73 = shalt.err (!%p70_p12)
}
  0x1c   :  { %s74_s23 = scalar_lea.hbm %s125_s1, 128 }
  0x1d   :  { %p75_p13 = scmp.ne.s32.totalorder %s125_s1, %s74_s23  ;;  %p78_p0 = scmp.lt.u32.totalorder %s74_s23, %s125_s1 }
  0x1f   :  { %p80_p1 = pnand %p78_p0, %p75_p13 }
  0x21   :  { %83 = shalt.err (!%p80_p1)
}
  0x22   :  { %32 = dma.vmem_to_hbm [thread:$0]  %s30_s19, 128, %s125_s1, [#allocation4]  }
  0x23   :  { %86 = dma.done.wait [#allocation4], 128  }
  0x24   :  { %87 = vsyncadd [#allocation4], 4294967168 }
  0x25   :  { %36 = vsyncpa [#allocation3], 1 }
  0x26   :  { %37 = vsyncpa [#allocation4], 1 }

// kernel: tpu_custom_call.1
= control target key start
LH: loop header
LB: loop body
LE: loop exit
PB: predicated region body
PF: predicated region fallthrough
CT: control target
= control target key end

     0   :  { %9 = vsyncpa [#allocation4], 0  ;;  %s799_s0 = inlined_call_operand.hbm [shape: f32[128,128], index: 0, kind: input, shape index: {}]   ;;  %s800_s1 = inlined_call_operand.hbm [shape: f32[128,256], index: 1, kind: input, shape index: {}]   ;;  %s801_s2 = inlined_call_operand.hbm [shape: f32[256,128], index: 2, kind: input, shape index: {}]   ;;  %s802_s3 = inlined_call_operand.hbm [shape: f32[1,128], index: 3, kind: input, shape index: {}]   ;;  %s803_s4 = inlined_call_operand.hbm [shape: f32[128,128], index: 4, kind: output, shape index: {}]  }
   0x1   :  { %10 = vsyncpa [#allocation7], 0 }
   0x2   :  { %11 = vsyncpa [#allocation10], 0 }
   0x3   :  { %12 = vsyncpa [#allocation5], 0  ;;  %s696_s15 = smov [#allocation6]   ;;  %s578_s19 = scalar_lea.hbm %s800_s1, 4096 }
   0x4   :  { %s30_s16 = sshll.u32 %s696_s15, 4  ;;  %p579_p0 = scmp.ne.s32.totalorder %s800_s1, %s578_s19  ;;  %s31_s16 = int_to_ptr.vmem [resolvable:$true] %s30_s16 }
   0x5   :  { %p582_p1 = scmp.lt.u32.totalorder %s578_s19, %s800_s1 }
   0x7   :  { %p584_p2 = pnand %p582_p1, %p579_p0 }
   0x9   :  { %587 = shalt.err (!%p584_p2)
}
   0xa   :  { %s588_s24 = scalar_lea.vmem %s31_s16, 4096  ;;  %p593_p4 = scmp.lt.s32.totalorder %s31_s16, %s31_s16 }
   0xb   :  { %p589_p3 = scmp.ne.s32.totalorder %s31_s16, %s588_s24  ;;  %p594_p5 = scmp.lt.s32.totalorder %s588_s24, %s588_s24 }
   0xd   :  { %p595_p6 = por %p594_p5, %p593_p4 }
   0xf   :  { %p596_p7 = pnand %p595_p6, %p589_p3 }
  0x11   :  { %599 = shalt.err (!%p596_p7)
}
  0x12   :  { %s697_s25 = smov 256   ;;  %s698_s26 = smov 16  }
  0x13   :  { %36 = dma.hbm_to_vmem [thread:$0]  %s800_s1, 4096, %s31_s16, [#allocation7], %s697_s25, %s697_s25, %s698_s26  }
  0x14   :  { %s699_s29 = smov [#allocation3]   ;;  %s600_s7 = scalar_lea.hbm %s799_s0, 2048 }
  0x15   :  { %s18_s30 = sshll.u32 %s699_s29, 4  ;;  %p601_p8 = scmp.ne.s32.totalorder %s799_s0, %s600_s7  ;;  %s19_s30 = int_to_ptr.vmem [resolvable:$true] %s18_s30 }
  0x16   :  { %p604_p9 = scmp.lt.u32.totalorder %s600_s7, %s799_s0 }
  0x18   :  { %p606_p10 = pnand %p604_p9, %p601_p8 }
  0x1a   :  { %609 = shalt.err (!%p606_p10)
}
  0x1b   :  { %s610_s12 = scalar_lea.vmem %s19_s30, 2048  ;;  %p615_p12 = scmp.lt.s32.totalorder %s19_s30, %s19_s30 }
  0x1c   :  { %p611_p11 = scmp.ne.s32.totalorder %s19_s30, %s610_s12  ;;  %p616_p13 = scmp.lt.s32.totalorder %s610_s12, %s610_s12 }
  0x1e   :  { %p617_p0 = por %p616_p13, %p615_p12 }
  0x20   :  { %p618_p1 = pnand %p617_p0, %p611_p11 }
  0x22   :  { %621 = shalt.err (!%p618_p1)
}
  0x23   :  { %s700_s1 = smov 128   ;;  %s701_s13 = smov 8  }
  0x24   :  { %24 = dma.hbm_to_vmem [thread:$0]  %s799_s0, 2048, %s19_s30, [#allocation4], %s700_s1, %s700_s1, %s701_s13  }
  0x25   :  { %s702_s16 = smov [#allocation8]   ;;  %s703_s18 = smov [#allocation9]  }
  0x26   :  { %s42_s17 = sshll.u32 %s702_s16, 4  ;;  %s55_s19 = sshll.u32 %s703_s18, 4  ;;  %s43_s17 = int_to_ptr.vmem [resolvable:$true] %s42_s17  ;;  %s56_s19 = int_to_ptr.vmem [resolvable:$true] %s55_s19 }
  0x27   :  { %s622_s22 = scalar_lea.hbm %s801_s2, 4096 }
  0x28   :  { %p623_p2 = scmp.ne.s32.totalorder %s801_s2, %s622_s22  ;;  %p626_p3 = scmp.lt.u32.totalorder %s622_s22, %s801_s2 }
  0x2a   :  { %p628_p4 = pnand %p626_p3, %p623_p2 }
  0x2c   :  { %631 = shalt.err (!%p628_p4)
}
  0x2d   :  { %s632_s0 = scalar_lea.vmem %s43_s17, 4096  ;;  %p637_p6 = scmp.lt.s32.totalorder %s43_s17, %s43_s17 }
  0x2e   :  { %p633_p5 = scmp.ne.s32.totalorder %s43_s17, %s632_s0  ;;  %p638_p7 = scmp.lt.s32.totalorder %s632_s0, %s632_s0 }
  0x30   :  { %p639_p8 = por %p638_p7, %p637_p6 }
  0x32   :  { %p640_p9 = pnand %p639_p8, %p633_p5 }
  0x34   :  { %643 = shalt.err (!%p640_p9)
}
  0x35   :  { %48 = dma.hbm_to_vmem [thread:$0]  %s801_s2, 4096, %s43_s17, [#allocation7], %s700_s1, %s700_s1, %s701_s13  }
  0x36   :  { %s644_s5 = scalar_lea.hbm %s802_s3, 16 }
  0x37   :  { %p645_p10 = scmp.ne.s32.totalorder %s802_s3, %s644_s5  ;;  %p648_p11 = scmp.lt.u32.totalorder %s644_s5, %s802_s3 }
  0x39   :  { %p650_p12 = pnand %p648_p11, %p645_p10 }
  0x3b   :  { %653 = shalt.err (!%p650_p12)
}
  0x3c   :  { %s654_s10 = scalar_lea.vmem %s56_s19, 16  ;;  %s658_s11 = scalar_lea.vmem %s56_s19, 32 }
  0x3d   :  { %p655_p13 = scmp.ne.s32.totalorder %s56_s19, %s654_s10  ;;  %p659_p0 = scmp.lt.s32.totalorder %s56_s19, %s56_s19 }
  0x3e   :  { %p660_p1 = scmp.lt.s32.totalorder %s658_s11, %s654_s10 }
  0x40   :  { %p661_p2 = por %p660_p1, %p659_p0 }
  0x42   :  { %p662_p3 = pnand %p661_p2, %p655_p13 }
  0x44   :  { %665 = shalt.err (!%p662_p3)
}
  0x45   :  { %58 = dma.hbm_to_vmem [thread:$0]  %s802_s3, 16, %s56_s19, [#allocation10]  }
  0x46   :  { %688 = dma.done.wait [#allocation4], 2048  }
  0x47   :  { %689 = vsyncadd [#allocation4], 4294965248 }
  0x48   :  { %690 = dma.done.wait [#allocation7], 8192  }
  0x49   :  { %691 = vsyncadd [#allocation7], 4294959104 }
  0x4a   :  { %692 = dma.done.wait [#allocation10], 16  }
  0x4b   :  { %693 = vsyncadd [#allocation10], 4294967280  ;;  %v140_v0 = vld [vmem:[#allocation8 + $0x80] sm:$0xff]  ;;  %v141_v1 = vld [vmem:[#allocation8 + $0x88] sm:$0xff]  ;;  %s704_s3 = smov [#allocation11]  }
  0x4c   :  { %v124_v2 = vld [vmem:[#allocation8] sm:$0xff]  ;;  %v164_v3 = vpack.c.bf16 %v141_v1, %v140_v0  ;;  %v125_v4 = vld [vmem:[#allocation8 + $0x8] sm:$0xff]  ;;  %v142_v5 = vld [vmem:[#allocation8 + $0x90] sm:$0xff]  ;;  %s442_s14 = sshll.u32 %s704_s3, 4  ;;  %s443_s14 = int_to_ptr.vmem [resolvable:$true] %s442_s14 }
  0x4d   :  { %v143_v6 = vld [vmem:[#allocation8 + $0x98] sm:$0xff]  ;;  %v156_v7 = vpack.c.bf16 %v125_v4, %v124_v2  ;;  %v126_v9 = vld [vmem:[#allocation8 + $0x10] sm:$0xff]  ;;  %v144_v11 = vld [vmem:[#allocation8 + $0xa0] sm:$0xff]  ;;  %s666_s15 = scalar_lea.vmem %s443_s14, 2048  ;;  %p671_p5 = scmp.lt.s32.totalorder %s443_s14, %s443_s14 }
  0x4e   :  { %v165_v8 = vpack.c.bf16 %v143_v6, %v142_v5  ;;  %v127_v10 = vld [vmem:[#allocation8 + $0x18] sm:$0xff]  ;;  %457 = vmatprep.subr.bf16.mxu0 %v164_v3  ;;  %v145_v12 = vld [vmem:[#allocation8 + $0xa8] sm:$0xff]  ;;  %v128_v15 = vld [vmem:[#allocation8 + $0x20] sm:$0xff]  ;;  %p667_p4 = scmp.ne.s32.totalorder %s443_s14, %s666_s15  ;;  %p672_p6 = scmp.lt.s32.totalorder %s666_s15, %s666_s15 }
  0x4f   :  { %458 = vmatpush3.bf16.msra.mxu0 %v156_v7  ;;  %v157_v13 = vpack.c.bf16 %v127_v10, %v126_v9  ;;  %v166_v14 = vpack.c.bf16 %v145_v12, %v144_v11  ;;  %v129_v16 = vld [vmem:[#allocation8 + $0x28] sm:$0xff]  ;;  %v146_v17 = vld [vmem:[#allocation8 + $0xb0] sm:$0xff]  ;;  %v147_v18 = vld [vmem:[#allocation8 + $0xb8] sm:$0xff] }
  0x50   :  { %459 = vmatprep.subr.bf16.mxu0 %v165_v8  ;;  %v158_v19 = vpack.c.bf16 %v129_v16, %v128_v15  ;;  %v167_v20 = vpack.c.bf16 %v147_v18, %v146_v17  ;;  %v130_v21 = vld [vmem:[#allocation8 + $0x30] sm:$0xff]  ;;  %v131_v22 = vld [vmem:[#allocation8 + $0x38] sm:$0xff]  ;;  %v148_v23 = vld [vmem:[#allocation8 + $0xc0] sm:$0xff]  ;;  %p673_p7 = por %p672_p6, %p671_p5 }
  0x51   :  { %v149_v24 = vld [vmem:[#allocation8 + $0xc8] sm:$0xff]  ;;  %v79_v26 = vld [vmem:[#allocation6 + $0x18] sm:$0xff]  ;;  %v159_v27 = vpack.c.bf16 %v131_v22, %v130_v21  ;;  %v132_v30 = vld [vmem:[#allocation8 + $0x40] sm:$0xff] }
  0x52   :  { %v77_v25 = vld [vmem:[#allocation6 + $0x8] sm:$0xff]  ;;  %v168_v29 = vpack.c.bf16 %v149_v24, %v148_v23  ;;  %v150_v32 = vld [vmem:[#allocation8 + $0xd0] sm:$0xff]  ;;  %v151_v33 = vld [vmem:[#allocation8 + $0xd8] sm:$0xff]  ;;  %p674_p8 = pnand %p673_p7, %p667_p4 }
  0x53   :  { %460 = vmatpush3.bf16.msra.mxu0 %v157_v13  ;;  %v109_v28 = vpack.c.bf16 %v79_v26, %v77_v25  ;;  %v133_v31 = vld [vmem:[#allocation8 + $0x48] sm:$0xff]  ;;  %v169_v35 = vpack.c.bf16 %v151_v33, %v150_v32  ;;  %v134_v36 = vld [vmem:[#allocation8 + $0x50] sm:$0xff]  ;;  %v135_v37 = vld [vmem:[#allocation8 + $0x58] sm:$0xff] }
  0x54   :  { %461 = vmatprep.subr.bf16.mxu0 %v166_v14  ;;  %v160_v34 = vpack.c.bf16 %v133_v31, %v132_v30  ;;  %v152_v38 = vld [vmem:[#allocation8 + $0xe0] sm:$0xff]  ;;  %v153_v39 = vld [vmem:[#allocation8 + $0xe8] sm:$0xff]  ;;  %v161_v40 = vpack.c.bf16 %v135_v37, %v134_v36  ;;  %v154_v44 = vld [vmem:[#allocation8 + $0xf0] sm:$0xff] }
  0x55   :  { %204 = vmatprep.mubr.bf16.mxu0 %v109_v28  ;;  %v170_v41 = vpack.c.bf16 %v153_v39, %v152_v38  ;;  %v136_v42 = vld [vmem:[#allocation8 + $0x60] sm:$0xff]  ;;  %v137_v43 = vld [vmem:[#allocation8 + $0x68] sm:$0xff]  ;;  %v155_v45 = vld [vmem:[#allocation8 + $0xf8] sm:$0xff] }
  0x56   :  { %v162_v46 = vpack.c.bf16 %v137_v43, %v136_v42  ;;  %v171_v47 = vpack.c.bf16 %v155_v45, %v154_v44  ;;  %v138_v48 = vld [vmem:[#allocation8 + $0x70] sm:$0xff]  ;;  %v139_v49 = vld [vmem:[#allocation8 + $0x78] sm:$0xff]  ;;  %v76_v51 = vld [vmem:[#allocation6] sm:$0xff] }
  0x57   :  { %462 = vmatpush3.bf16.msra.mxu0 %v158_v19  ;;  %v163_v50 = vpack.c.bf16 %v139_v49, %v138_v48  ;;  %v78_v52 = vld [vmem:[#allocation6 + $0x10] sm:$0xff]  ;;  %v81_v53 = vld [vmem:[#allocation6 + $0x28] sm:$0xff]  ;;  %v83_v54 = vld [vmem:[#allocation6 + $0x38] sm:$0xff] }
  0x58   :  { %463 = vmatprep.subr.bf16.mxu0 %v167_v20  ;;  %v108_v55 = vpack.c.bf16 %v78_v52, %v76_v51  ;;  %v111_v56 = vpack.c.bf16 %v83_v54, %v81_v53  ;;  %v80_v57 = vld [vmem:[#allocation6 + $0x20] sm:$0xff]  ;;  %v82_v58 = vld [vmem:[#allocation6 + $0x30] sm:$0xff]  ;;  %v85_v59 = vld [vmem:[#allocation6 + $0x48] sm:$0xff] }
  0x59   :  { %v87_v60 = vld [vmem:[#allocation6 + $0x58] sm:$0xff]  ;;  %v110_v61 = vpack.c.bf16 %v82_v58, %v80_v57  ;;  %v84_v63 = vld [vmem:[#allocation6 + $0x40] sm:$0xff]  ;;  %v86_v0 = vld [vmem:[#allocation6 + $0x50] sm:$0xff] }
  0x5a   :  { %v113_v62 = vpack.c.bf16 %v87_v60, %v85_v59  ;;  %v89_v1 = vld [vmem:[#allocation6 + $0x68] sm:$0xff]  ;;  %v91_v2 = vld [vmem:[#allocation6 + $0x78] sm:$0xff]  ;;  %v112_v3 = vpack.c.bf16 %v86_v0, %v84_v63  ;;  %v88_v5 = vld [vmem:[#allocation6 + $0x60] sm:$0xff] }
  0x5b   :  { %464 = vmatpush3.bf16.msra.mxu0 %v159_v27  ;;  %v115_v4 = vpack.c.bf16 %v91_v2, %v89_v1  ;;  %v90_v6 = vld [vmem:[#allocation6 + $0x70] sm:$0xff]  ;;  %v93_v7 = vld [vmem:[#allocation6 + $0x88] sm:$0xff]  ;;  %v95_v8 = vld [vmem:[#allocation6 + $0x98] sm:$0xff] }
  0x5c   :  { %465 = vmatprep.subr.bf16.mxu0 %v168_v29  ;;  %v114_v9 = vpack.c.bf16 %v90_v6, %v88_v5  ;;  %v117_v10 = vpack.c.bf16 %v95_v8, %v93_v7  ;;  %v92_v11 = vld [vmem:[#allocation6 + $0x80] sm:$0xff]  ;;  %v94_v12 = vld [vmem:[#allocation6 + $0x90] sm:$0xff]  ;;  %v97_v13 = vld [vmem:[#allocation6 + $0xa8] sm:$0xff] }
  0x5d   :  { %v99_v14 = vld [vmem:[#allocation6 + $0xb8] sm:$0xff]  ;;  %v116_v15 = vpack.c.bf16 %v94_v12, %v92_v11  ;;  %v96_v17 = vld [vmem:[#allocation6 + $0xa0] sm:$0xff]  ;;  %v98_v18 = vld [vmem:[#allocation6 + $0xb0] sm:$0xff] }
  0x5e   :  { %v119_v16 = vpack.c.bf16 %v99_v14, %v97_v13  ;;  %v101_v19 = vld [vmem:[#allocation6 + $0xc8] sm:$0xff]  ;;  %v103_v20 = vld [vmem:[#allocation6 + $0xd8] sm:$0xff]  ;;  %v118_v21 = vpack.c.bf16 %v98_v18, %v96_v17  ;;  %v100_v23 = vld [vmem:[#allocation6 + $0xc0] sm:$0xff] }
  0x5f   :  { %466 = vmatpush3.bf16.msra.mxu0 %v160_v34  ;;  %v121_v22 = vpack.c.bf16 %v103_v20, %v101_v19  ;;  %v102_v24 = vld [vmem:[#allocation6 + $0xd0] sm:$0xff]  ;;  %v105_v25 = vld [vmem:[#allocation6 + $0xe8] sm:$0xff]  ;;  %v107_v26 = vld [vmem:[#allocation6 + $0xf8] sm:$0xff] }
  0x60   :  { %467 = vmatprep.subr.bf16.mxu0 %v169_v35  ;;  %v120_v27 = vpack.c.bf16 %v102_v24, %v100_v23  ;;  %v123_v28 = vpack.c.bf16 %v107_v26, %v105_v25  ;;  %v104_v29 = vld [vmem:[#allocation6 + $0xe0] sm:$0xff]  ;;  %v106_v30 = vld [vmem:[#allocation6 + $0xf0] sm:$0xff]  ;;  %v286_v33 = vld [vmem:[#allocation3 + $0x8] sm:$0xff] }
  0x61   :  { %v122_v31 = vpack.c.bf16 %v106_v30, %v104_v29  ;;  %v285_v32 = vld [vmem:[#allocation3] sm:$0xff]  ;;  %v287_v26 = vld [vmem:[#allocation3 + $0x10] sm:$0xff]  ;;  %v290_v30 = vld [vmem:[#allocation3 + $0x28] sm:$0xff] }
  0x62   :  { %v301_v34 = vpack.c.bf16 %v286_v33, %v285_v32  ;;  %v289_v29 = vld [vmem:[#allocation3 + $0x20] sm:$0xff]  ;;  %v291_v33 = vld [vmem:[#allocation3 + $0x30] sm:$0xff] }
  0x63   :  { %468 = vmatpush3.bf16.msra.mxu0 %v161_v40  ;;  %v303_v32 = vpack.c.bf16 %v290_v30, %v289_v29 }
  0x64   :  { %469 = vmatprep.subr.bf16.mxu0 %v170_v41  ;;  %553 = vmatprep.mubr.bf16.mxu1 %v301_v34  ;;  %v292_v34 = vld [vmem:[#allocation3 + $0x38] sm:$0xff] }
  0x67   :  { %470 = vmatpush3.bf16.msra.mxu0 %v162_v46 }
  0x68   :  { %471 = vmatprep.subr.bf16.mxu0 %v171_v47 }
  0x6b   :  { %472 = vmatpush3.bf16.msra.mxu0 %v163_v50 }
  0x6e   :  { %205 = vmatmul.mubr.bf16.vlgmr.msra.gmra.mrb[0].mxu0 %v108_v55 }
  0x6f   :  { %212 = vmatprep.mubr.bf16.mxu0 %v111_v56 }
  0x76   :  { %213 = vmatmul.mubr.bf16.gmra.mrb[4].mxu0 %v110_v61 }
  0x77   :  { %220 = vmatprep.mubr.bf16.mxu0 %v113_v62 }
  0x7e   :  { %221 = vmatmul.mubr.bf16.gmra.mrb[8].mxu0 %v112_v3 }
  0x7f   :  { %228 = vmatprep.mubr.bf16.mxu0 %v115_v4 }
  0x86   :  { %229 = vmatmul.mubr.bf16.gmra.mrb[12].mxu0 %v114_v9 }
  0x87   :  { %236 = vmatprep.mubr.bf16.mxu0 %v117_v10 }
  0x8e   :  { %237 = vmatmul.mubr.bf16.gmra.mrb[16].mxu0 %v116_v15 }
  0x8f   :  { %244 = vmatprep.mubr.bf16.mxu0 %v119_v16 }
  0x96   :  { %245 = vmatmul.mubr.bf16.gmra.mrb[20].mxu0 %v118_v21 }
  0x97   :  { %252 = vmatprep.mubr.bf16.mxu0 %v121_v22 }
  0x9e   :  { %253 = vmatmul.mubr.bf16.gmra.mrb[24].mxu0 %v120_v27  ;;  %v288_v27 = vld [vmem:[#allocation3 + $0x18] sm:$0xff] }
  0x9f   :  { %260 = vmatprep.mubr.bf16.mxu0 %v123_v28 }
  0xa6   :  { %261 = vmatmul.mubr.bf16.gmra.mrb[28].mxu0 %v122_v31  ;;  %v302_v31 = vpack.c.bf16 %v288_v27, %v287_v26 }
 0x141   :  { %v473_v35 = vpop.f32.mrb[0].mxu0 }
 0x142   :  { %v474_v36 = vpop.f32.mrb[1].mxu0 }
 0x143   :  { %v475_v37 = vadd.f32 %v474_v36, %v473_v35  ;;  %v476_v38 = vpop.f32.mrb[2].mxu0  ;;  %v293_v35 = vld [vmem:[#allocation3 + $0x40] sm:$0xff]  ;;  %v294_v36 = vld [vmem:[#allocation3 + $0x48] sm:$0xff] }
 0x144   :  { %v477_v39 = vpop.f32.mrb[3].mxu0 }
 0x145   :  { %v478_v40 = vadd.f32 %v477_v39, %v476_v38  ;;  %v305_v38 = vpack.c.bf16 %v294_v36, %v293_v35  ;;  %v295_v39 = vld [vmem:[#allocation3 + $0x50] sm:$0xff] }
 0x147   :  { %v269_v41 = vpack.c.bf16 %v478_v40, %v475_v37  ;;  %v304_v37 = vpack.c.bf16 %v292_v34, %v291_v33  ;;  %v296_v40 = vld [vmem:[#allocation3 + $0x58] sm:$0xff] }
 0x149   :  { %v479_v42 = vpop.f32.mrb[4].mxu0  ;;  %537 = vmatprep.subr.bf16.mxu1 %v269_v41 }
 0x14a   :  { %v480_v43 = vpop.f32.mrb[5].mxu0  ;;  %538 = vmatpush3.bf16.msra.mxu1 %v269_v41  ;;  %v297_v41 = vld [vmem:[#allocation3 + $0x60] sm:$0xff] }
 0x14b   :  { %v481_v44 = vadd.f32 %v480_v43, %v479_v42  ;;  %v482_v45 = vpop.f32.mrb[6].mxu0  ;;  %v298_v42 = vld [vmem:[#allocation3 + $0x68] sm:$0xff]  ;;  %v306_v43 = vpack.c.bf16 %v296_v40, %v295_v39 }
 0x14c   :  { %v483_v46 = vpop.f32.mrb[7].mxu0 }
 0x14d   :  { %v484_v47 = vadd.f32 %v483_v46, %v482_v45  ;;  %v299_v45 = vld [vmem:[#allocation3 + $0x70] sm:$0xff]  ;;  %v300_v46 = vld [vmem:[#allocation3 + $0x78] sm:$0xff] }
 0x14f   :  { %v270_v48 = vpack.c.bf16 %v484_v47, %v481_v44  ;;  %v307_v44 = vpack.c.bf16 %v298_v42, %v297_v41  ;;  %v308_v47 = vpack.c.bf16 %v300_v46, %v299_v45 }
 0x151   :  { %v485_v49 = vpop.f32.mrb[8].mxu0  ;;  %539 = vmatprep.subr.bf16.mxu1 %v270_v48 }
 0x152   :  { %v486_v50 = vpop.f32.mrb[9].mxu0  ;;  %540 = vmatpush3.bf16.msra.mxu1 %v270_v48  ;;  %v456_v48 = vld [vmem:[#allocation9] ss:$0 sm:$0xff] }
 0x153   :  { %v487_v51 = vadd.f32 %v486_v50, %v485_v49  ;;  %v488_v52 = vpop.f32.mrb[10].mxu0 }
 0x154   :  { %v489_v53 = vpop.f32.mrb[11].mxu0 }
 0x155   :  { %v490_v54 = vadd.f32 %v489_v53, %v488_v52 }
 0x157   :  { %v271_v55 = vpack.c.bf16 %v490_v54, %v487_v51 }
 0x159   :  { %v491_v56 = vpop.f32.mrb[12].mxu0  ;;  %541 = vmatprep.subr.bf16.mxu1 %v271_v55 }
 0x15a   :  { %v492_v57 = vpop.f32.mrb[13].mxu0  ;;  %542 = vmatpush3.bf16.msra.mxu1 %v271_v55 }
 0x15b   :  { %v493_v58 = vadd.f32 %v492_v57, %v491_v56  ;;  %v494_v59 = vpop.f32.mrb[14].mxu0 }
 0x15c   :  { %v495_v60 = vpop.f32.mrb[15].mxu0 }
 0x15d   :  { %v496_v61 = vadd.f32 %v495_v60, %v494_v59 }
 0x15f   :  { %v272_v62 = vpack.c.bf16 %v496_v61, %v493_v58 }
 0x161   :  { %v497_v63 = vpop.f32.mrb[16].mxu0  ;;  %543 = vmatprep.subr.bf16.mxu1 %v272_v62 }
 0x162   :  { %v498_v0 = vpop.f32.mrb[17].mxu0  ;;  %544 = vmatpush3.bf16.msra.mxu1 %v272_v62 }
 0x163   :  { %v499_v1 = vadd.f32 %v498_v0, %v497_v63  ;;  %v500_v2 = vpop.f32.mrb[18].mxu0 }
 0x164   :  { %v501_v3 = vpop.f32.mrb[19].mxu0 }
 0x165   :  { %v502_v4 = vadd.f32 %v501_v3, %v500_v2 }
 0x167   :  { %v273_v5 = vpack.c.bf16 %v502_v4, %v499_v1 }
 0x169   :  { %v503_v6 = vpop.f32.mrb[20].mxu0  ;;  %545 = vmatprep.subr.bf16.mxu1 %v273_v5 }
 0x16a   :  { %v504_v7 = vpop.f32.mrb[21].mxu0  ;;  %546 = vmatpush3.bf16.msra.mxu1 %v273_v5 }
 0x16b   :  { %v505_v8 = vadd.f32 %v504_v7, %v503_v6  ;;  %v506_v9 = vpop.f32.mrb[22].mxu0 }
 0x16c   :  { %v507_v10 = vpop.f32.mrb[23].mxu0 }
 0x16d   :  { %v508_v11 = vadd.f32 %v507_v10, %v506_v9 }
 0x16f   :  { %v274_v12 = vpack.c.bf16 %v508_v11, %v505_v8 }
 0x171   :  { %v509_v13 = vpop.f32.mrb[24].mxu0  ;;  %547 = vmatprep.subr.bf16.mxu1 %v274_v12 }
 0x172   :  { %v510_v14 = vpop.f32.mrb[25].mxu0  ;;  %548 = vmatpush3.bf16.msra.mxu1 %v274_v12 }
 0x173   :  { %v511_v15 = vadd.f32 %v510_v14, %v509_v13  ;;  %v512_v16 = vpop.f32.mrb[26].mxu0 }
 0x174   :  { %v513_v17 = vpop.f32.mrb[27].mxu0 }
 0x175   :  { %v514_v18 = vadd.f32 %v513_v17, %v512_v16 }
 0x177   :  { %v275_v19 = vpack.c.bf16 %v514_v18, %v511_v15 }
 0x179   :  { %v515_v20 = vpop.f32.mrb[28].mxu0  ;;  %549 = vmatprep.subr.bf16.mxu1 %v275_v19 }
 0x17a   :  { %v516_v21 = vpop.f32.mrb[29].mxu0  ;;  %550 = vmatpush3.bf16.msra.mxu1 %v275_v19 }
 0x17b   :  { %v517_v22 = vadd.f32 %v516_v21, %v515_v20  ;;  %v518_v23 = vpop.f32.mrb[30].mxu0 }
 0x17c   :  { %v519_v24 = vpop.f32.mrb[31].mxu0 }
 0x17d   :  { %v520_v25 = vadd.f32 %v519_v24, %v518_v23 }
 0x17f   :  { %v276_v28 = vpack.c.bf16 %v520_v25, %v517_v22 }
 0x181   :  { %551 = vmatprep.subr.bf16.mxu1 %v276_v28 }
 0x182   :  { %552 = vmatpush3.bf16.msra.mxu1 %v276_v28 }
 0x185   :  { %554 = vmatmul.mubr.bf16.vlgmr.msra.gmra.mrb[0].mxu1 %v302_v31 }
 0x186   :  { %557 = vmatprep.mubr.bf16.mxu1 %v303_v32 }
 0x18d   :  { %558 = vmatmul.mubr.bf16.gmra.mrb[4].mxu1 %v304_v37 }
 0x18e   :  { %561 = vmatprep.mubr.bf16.mxu1 %v305_v38 }
 0x195   :  { %562 = vmatmul.mubr.bf16.gmra.mrb[8].mxu1 %v306_v43 }
 0x196   :  { %565 = vmatprep.mubr.bf16.mxu1 %v307_v44 }
 0x19d   :  { %566 = vmatmul.mubr.bf16.gmra.mrb[12].mxu1 %v308_v47 }
 0x258   :  { %v555_v49 = vpop.f32.mrb[0].mxu1 }
 0x259   :  { %v367_v50 = vadd.f32 %v555_v49, %v456_v48  ;;  %v358_v51 = vpop.f32.mrb[1].mxu1 }
 0x25a   :  { %v359_v52 = vadd.f32 %v456_v48, %v358_v51  ;;  %v556_v53 = vpop.f32.mrb[2].mxu1 }
 0x25b   :  { %423 = vst [vmem:[#allocation11 + $0x10] sm:$0xff] %v367_v50  ;;  %v370_v54 = vadd.f32 %v556_v53, %v456_v48  ;;  %v361_v55 = vpop.f32.mrb[3].mxu1 }
 0x25c   :  { %421 = vst [vmem:[#allocation11] sm:$0xff] %v359_v52  ;;  %v362_v56 = vadd.f32 %v456_v48, %v361_v55 }
 0x25d   :  { %424 = vst [vmem:[#allocation11 + $0x18] sm:$0xff] %v370_v54 }
 0x25e   :  { %422 = vst [vmem:[#allocation11 + $0x8] sm:$0xff] %v362_v56 }
 0x260   :  { %v559_v57 = vpop.f32.mrb[4].mxu1 }
 0x261   :  { %v383_v58 = vadd.f32 %v559_v57, %v456_v48  ;;  %v374_v59 = vpop.f32.mrb[5].mxu1 }
 0x262   :  { %v375_v60 = vadd.f32 %v456_v48, %v374_v59  ;;  %v560_v61 = vpop.f32.mrb[6].mxu1 }
 0x263   :  { %427 = vst [vmem:[#allocation11 + $0x30] sm:$0xff] %v383_v58  ;;  %v386_v62 = vadd.f32 %v560_v61, %v456_v48  ;;  %v377_v63 = vpop.f32.mrb[7].mxu1 }
 0x264   :  { %425 = vst [vmem:[#allocation11 + $0x20] sm:$0xff] %v375_v60  ;;  %v378_v0 = vadd.f32 %v456_v48, %v377_v63 }
 0x265   :  { %428 = vst [vmem:[#allocation11 + $0x38] sm:$0xff] %v386_v62 }
 0x266   :  { %426 = vst [vmem:[#allocation11 + $0x28] sm:$0xff] %v378_v0 }
 0x268   :  { %v563_v1 = vpop.f32.mrb[8].mxu1 }
 0x269   :  { %v399_v2 = vadd.f32 %v563_v1, %v456_v48  ;;  %v390_v3 = vpop.f32.mrb[9].mxu1 }
 0x26a   :  { %v391_v4 = vadd.f32 %v456_v48, %v390_v3  ;;  %v564_v5 = vpop.f32.mrb[10].mxu1 }
 0x26b   :  { %431 = vst [vmem:[#allocation11 + $0x50] sm:$0xff] %v399_v2  ;;  %v402_v6 = vadd.f32 %v564_v5, %v456_v48  ;;  %v393_v7 = vpop.f32.mrb[11].mxu1 }
 0x26c   :  { %429 = vst [vmem:[#allocation11 + $0x40] sm:$0xff] %v391_v4  ;;  %v394_v8 = vadd.f32 %v456_v48, %v393_v7 }
 0x26d   :  { %432 = vst [vmem:[#allocation11 + $0x58] sm:$0xff] %v402_v6 }
 0x26e   :  { %430 = vst [vmem:[#allocation11 + $0x48] sm:$0xff] %v394_v8 }
 0x270   :  { %v567_v9 = vpop.f32.mrb[12].mxu1 }
 0x271   :  { %v415_v10 = vadd.f32 %v567_v9, %v456_v48  ;;  %v406_v11 = vpop.f32.mrb[13].mxu1 }
 0x272   :  { %v407_v12 = vadd.f32 %v456_v48, %v406_v11  ;;  %v568_v13 = vpop.f32.mrb[14].mxu1 }
 0x273   :  { %435 = vst [vmem:[#allocation11 + $0x70] sm:$0xff] %v415_v10  ;;  %v418_v14 = vadd.f32 %v568_v13, %v456_v48  ;;  %v409_v15 = vpop.f32.mrb[15].mxu1 }
 0x274   :  { %433 = vst [vmem:[#allocation11 + $0x60] sm:$0xff] %v407_v12  ;;  %v410_v16 = vadd.f32 %v456_v48, %v409_v15 }
 0x275   :  { %436 = vst [vmem:[#allocation11 + $0x78] sm:$0xff] %v418_v14 }
 0x276   :  { %434 = vst [vmem:[#allocation11 + $0x68] sm:$0xff] %v410_v16 }
 0x277   :  { %677 = shalt.err (!%p674_p8)
}
 0x278   :  { %s678_s18 = scalar_lea.hbm %s803_s4, 2048 }
 0x279   :  { %p679_p9 = scmp.ne.s32.totalorder %s803_s4, %s678_s18  ;;  %p682_p10 = scmp.lt.u32.totalorder %s678_s18, %s803_s4 }
 0x27b   :  { %p684_p11 = pnand %p682_p10, %p679_p9 }
 0x27d   :  { %687 = shalt.err (!%p684_p11)
}
 0x27e   :  { %448 = dma.vmem_to_hbm [thread:$0]  %s443_s14, 2048, %s803_s4, [#allocation5], %s700_s1, %s700_s1, %s701_s13  }
 0x27f   :  { %694 = dma.done.wait [#allocation5], 2048  }
 0x280   :  { %695 = vsyncadd [#allocation5], 4294965248 }
 0x281   :  { %452 = vsyncpa [#allocation4], 1 }
 0x282   :  { %453 = vsyncpa [#allocation7], 1 }
 0x283   :  { %454 = vsyncpa [#allocation10], 1 }
 0x284   :  { %455 = vsyncpa [#allocation5], 1 }

</bundles_post_ra>
